<compile_context>
chip_gen: v5e
topology: v5e:2x2
jax: 0.10.0
libtpu: 0.0.40
codegen_flags: <defaults>
</compile_context>

<pallas_src>
import functools

import jax
import jax.numpy as jnp
from jax.experimental import pallas as pl
from jax.experimental.pallas import tpu as pltpu


def _se_kernel(x_ref, xse_ref, w1_ref, b1_ref, w2_ref, b2_ref, o_ref):
    # x_ref / xse_ref / o_ref : (C, T)  -- spatial axis last (lane-dense)
    # w1_ref / w2_ref         : (C, C)  -- (C_out, C_in), activation dtype
    # b1_ref / b2_ref         : (C, 1)  -- f32
    xse = xse_ref[...]

    # conv_reduce (1x1 conv == channel matmul) + bias + ReLU. Both MXU operands
    # are in the activation dtype; accumulate in f32.
    h = jnp.dot(w1_ref[...], xse, preferred_element_type=jnp.float32) + b1_ref[...]
    h = jnp.maximum(h, 0.0)

    # conv_expand + bias (MXU inputs stay in the weight == activation dtype).
    g = jnp.dot(w2_ref[...], h.astype(w2_ref.dtype),
                preferred_element_type=jnp.float32) + b2_ref[...]

    # sigmoid(g) == 0.5 * (tanh(g/2) + 1): one EUP op instead of exp + recip.
    g = 0.5 * (jnp.tanh(0.5 * g) + 1.0)

    # Gate in the input dtype: avoids upcasting the x stream to f32 (saves VALU
    # passes and vreg pressure; exact for the f32 path).
    o_ref[...] = (x_ref[...] * g.astype(x_ref.dtype)).astype(o_ref.dtype)


def _vmem_capacity_bytes():
    # Trace-time hardware query; fall back to a v7x-conservative value.
    try:
        return int(pltpu.get_tpu_info().vmem_capacity_bytes)
    except Exception:
        return 64 << 20


def _const_spec(block_shape, index_map):
    # Constant operands: single-buffer them (they are DMA'd once since the
    # index_map never changes), halving their VMEM footprint. Fall back if this
    # JAX version lacks the pipeline_mode kwarg.
    try:
        return pl.BlockSpec(block_shape, index_map, pipeline_mode=pl.Buffered(1))
    except Exception:
        return pl.BlockSpec(block_shape, index_map)


@functools.partial(jax.jit, static_argnames=("t_hw",))
def se_layer(x, x_se, w_reduce, b_reduce, w_expand, b_expand, *, t_hw=1024):
    """x, x_se: (N, C, H, W) NCHW.  w_*: (C_out, C_in) from (C, C, 1, 1) convs."""
    N, C, H, W = x.shape
    HW = H * W

    # NCHW -> (N, C, H*W): pure view reshape, no transpose, no extra HBM pass.
    xf = x.reshape(N, C, HW)
    xsef = x_se.reshape(N, C, HW)

    # Cast weights once to the activation dtype -> native-dtype MXU operands
    # (avoids emulated f32/mixed matmul passes in the large-C regime).
    act_dt = x_se.dtype
    w1 = w_reduce.astype(act_dt)
    w2 = w_expand.astype(act_dt)
    b1 = b_reduce.reshape(C, 1).astype(jnp.float32)
    b2 = b_expand.reshape(C, 1).astype(jnp.float32)

    in_isz = jnp.dtype(x.dtype).itemsize
    w_isz = jnp.dtype(act_dt).itemsize

    # Per-chip VMEM budgets (v5e/v6e: 128 MiB physical; v7x: 64 MiB per TC).
    vmem_cap = _vmem_capacity_bytes()
    small_vmem = vmem_cap <= (64 << 20)
    tile_budget = (28 << 20) if small_vmem else (64 << 20)
    limit_cap = (48 << 20) if small_vmem else (96 << 20)

    def vmem_need(t):
        streams = 2 * 3 * C * t * in_isz          # double-buffered x / x_se / out
        consts = 2 * C * C * w_isz + 2 * C * 4    # single-buffered weights + biases
        temps = 3 * C * t * 4                     # f32 temporaries (h, g, gate)
        return streams + consts + temps

    # Spatial (lane) tile: full H*W when small, else a multiple of 128 capped by
    # the per-chip VMEM budget.
    if HW <= t_hw:
        T = HW                                    # single tile (masked only if HW%128 != 0)
    else:
        T = max((t_hw // 128) * 128, 128)
        while T > 128 and vmem_need(T) > tile_budget:
            T -= 128
        if small_vmem:
            # v7x: 2 TensorCores -> keep >= 8 grid steps so both get work.
            while T > 128 and N * (-(-HW // T)) < 8:
                T -= 128

    grid = (N, pl.cdiv(HW, T))   # Pallas masks the ragged final tile

    need = vmem_need(T)
    vmem_limit = int(min(max(need + (8 << 20), 32 << 20), limit_cap))

    out_flat = pl.pallas_call(
        _se_kernel,
        out_shape=jax.ShapeDtypeStruct((N, C, HW), x.dtype),
        grid_spec=pltpu.PrefetchScalarGridSpec(
            num_scalar_prefetch=0,
            grid=grid,
            in_specs=[
                pl.BlockSpec((None, C, T), lambda n, s: (n, 0, s)),   # x tile
                pl.BlockSpec((None, C, T), lambda n, s: (n, 0, s)),   # x_se tile
                _const_spec((C, C), lambda n, s: (0, 0)),             # w_reduce
                _const_spec((C, 1), lambda n, s: (0, 0)),             # b_reduce
                _const_spec((C, C), lambda n, s: (0, 0)),             # w_expand
                _const_spec((C, 1), lambda n, s: (0, 0)),             # b_expand
            ],
            out_specs=pl.BlockSpec((None, C, T), lambda n, s: (n, 0, s)),
        ),
        compiler_params=pltpu.CompilerParams(
            dimension_semantics=("parallel", "parallel"),
            vmem_limit_bytes=vmem_limit),
    )(xf, xsef, w1, b1, w2, b2)

    # (N, C, H*W) -> (N, C, H, W): free reshape.
    return out_flat.reshape(N, C, H, W)


def _reference(x, x_se, w1, b1, w2, b2):
    # pure-JAX reference of the PyTorch forward (1x1 convs as einsums), NCHW
    h = jnp.einsum("oc,nchw->nohw", w1, x_se) + b1[None, :, None, None]
    h = jnp.maximum(h, 0.0)
    g = jnp.einsum("oc,nchw->nohw", w2, h) + b2[None, :, None, None]
    g = jax.nn.sigmoid(g)
    return x * g


if __name__ == "__main__":
    N, C, H, W = 2, 4, 16, 16
    key = jax.random.PRNGKey(0)
    kx, kse, kw1, kb1, kw2, kb2 = jax.random.split(key, 6)

    x = jax.random.normal(kx, (N, C, H, W), dtype=jnp.float32)
    x_se = jax.random.normal(kse, (N, C, H, W), dtype=jnp.float32)

    # conv weights are (C_out, C_in, 1, 1) in PyTorch -> squeezed to (C, C)
    w_reduce = jax.random.normal(kw1, (C, C), dtype=jnp.float32) * 0.5
    b_reduce = jax.random.normal(kb1, (C,), dtype=jnp.float32) * 0.1
    w_expand = jax.random.normal(kw2, (C, C), dtype=jnp.float32) * 0.5
    b_expand = jax.random.normal(kb2, (C,), dtype=jnp.float32) * 0.1

    out = se_layer(x, x_se, w_reduce, b_reduce, w_expand, b_expand)
    out = jax.block_until_ready(out)

    ref = _reference(x, x_se, w_reduce, b_reduce, w_expand, b_expand)
    assert out.shape == ref.shape == (N, C, H, W)
    # (tanh-form sigmoid vs jax.nn.sigmoid differs by a few 1e-7 in f32)
    assert jnp.allclose(out, ref, atol=5e-5, rtol=1e-5), "mismatch vs reference"

    print("KERNEL_OK")
</pallas_src>

<mosaic_0001>
module attributes {stable_mosaic.version = 11 : i64} {
  func.func @_se_kernel(%arg0: i32, %arg1: i32, %arg2: memref<1x4x256xf32, #tpu.memory_space<vmem>>, %arg3: memref<1x4x256xf32, #tpu.memory_space<vmem>>, %arg4: memref<4x4xf32, #tpu.memory_space<vmem>>, %arg5: memref<4x1xf32, #tpu.memory_space<vmem>>, %arg6: memref<4x4xf32, #tpu.memory_space<vmem>>, %arg7: memref<4x1xf32, #tpu.memory_space<vmem>>, %arg8: memref<1x4x256xf32, #tpu.memory_space<vmem>>) attributes {dimension_semantics = [#tpu.dimension_semantics<parallel>, #tpu.dimension_semantics<parallel>], iteration_bounds = array<i64: 2, 1>, scalar_prefetch = 0 : i64, scratch_operands = 0 : i64, tpu.core_type = #tpu.core_type<tc>, window_params = [{transform_indices = @transform_0, window_bounds = array<i64: 1, 4, 256>}, {transform_indices = @transform_1, window_bounds = array<i64: 1, 4, 256>}, {pipeline_mode = #tpu.pipeline_mode<synchronous>, transform_indices = @transform_2, window_bounds = array<i64: 4, 4>}, {pipeline_mode = #tpu.pipeline_mode<synchronous>, transform_indices = @transform_3, window_bounds = array<i64: 4, 1>}, {pipeline_mode = #tpu.pipeline_mode<synchronous>, transform_indices = @transform_4, window_bounds = array<i64: 4, 4>}, {pipeline_mode = #tpu.pipeline_mode<synchronous>, transform_indices = @transform_5, window_bounds = array<i64: 4, 1>}, {transform_indices = @transform_6, window_bounds = array<i64: 1, 4, 256>}]} {
    %c0 = arith.constant 0 : index
    %c0_0 = arith.constant 0 : index
    %c0_1 = arith.constant 0 : index
    %0 = vector.load %arg3[%c0, %c0_0, %c0_1] : memref<1x4x256xf32, #tpu.memory_space<vmem>>, vector<1x4x256xf32>
    %1 = vector.shape_cast %0 : vector<1x4x256xf32> to vector<4x256xf32>
    %c0_2 = arith.constant 0 : index
    %c0_3 = arith.constant 0 : index
    %2 = vector.load %arg4[%c0_2, %c0_3] : memref<4x4xf32, #tpu.memory_space<vmem>>, vector<4x4xf32>
    %cst = arith.constant dense<0.000000e+00> : vector<4x256xf32>
    %3 = tpu.matmul %2, %1, %cst {dimension_numbers = #tpu.dot_dimension_numbers<[1], [0], [0], [1], [0, 0, 1, 1], [], []>} : vector<4x4xf32>, vector<4x256xf32>, vector<4x256xf32> -> vector<4x256xf32>
    %c0_4 = arith.constant 0 : index
    %c0_5 = arith.constant 0 : index
    %4 = vector.load %arg5[%c0_4, %c0_5] : memref<4x1xf32, #tpu.memory_space<vmem>>, vector<4x1xf32>
    %5 = vector.broadcast %4 : vector<4x1xf32> to vector<4x256xf32>
    %6 = arith.addf %3, %5 : vector<4x256xf32>
    %cst_6 = arith.constant 0.000000e+00 : f32
    %7 = vector.broadcast %cst_6 : f32 to vector<4x256xf32>
    %8 = arith.maximumf %6, %7 : vector<4x256xf32>
    %c0_7 = arith.constant 0 : index
    %c0_8 = arith.constant 0 : index
    %9 = vector.load %arg6[%c0_7, %c0_8] : memref<4x4xf32, #tpu.memory_space<vmem>>, vector<4x4xf32>
    %cst_9 = arith.constant dense<0.000000e+00> : vector<4x256xf32>
    %10 = tpu.matmul %9, %8, %cst_9 {dimension_numbers = #tpu.dot_dimension_numbers<[1], [0], [0], [1], [0, 0, 1, 1], [], []>} : vector<4x4xf32>, vector<4x256xf32>, vector<4x256xf32> -> vector<4x256xf32>
    %c0_10 = arith.constant 0 : index
    %c0_11 = arith.constant 0 : index
    %11 = vector.load %arg7[%c0_10, %c0_11] : memref<4x1xf32, #tpu.memory_space<vmem>>, vector<4x1xf32>
    %12 = vector.broadcast %11 : vector<4x1xf32> to vector<4x256xf32>
    %13 = arith.addf %10, %12 : vector<4x256xf32>
    %cst_12 = arith.constant 5.000000e-01 : f32
    %14 = vector.broadcast %cst_12 : f32 to vector<4x256xf32>
    %15 = arith.mulf %14, %13 : vector<4x256xf32>
    %16 = math.tanh %15 : vector<4x256xf32>
    %cst_13 = arith.constant 1.000000e+00 : f32
    %17 = vector.broadcast %cst_13 : f32 to vector<4x256xf32>
    %18 = arith.addf %16, %17 : vector<4x256xf32>
    %cst_14 = arith.constant 5.000000e-01 : f32
    %19 = vector.broadcast %cst_14 : f32 to vector<4x256xf32>
    %20 = arith.mulf %19, %18 : vector<4x256xf32>
    %c0_15 = arith.constant 0 : index
    %c0_16 = arith.constant 0 : index
    %c0_17 = arith.constant 0 : index
    %21 = vector.load %arg2[%c0_15, %c0_16, %c0_17] : memref<1x4x256xf32, #tpu.memory_space<vmem>>, vector<1x4x256xf32>
    %22 = vector.shape_cast %21 : vector<1x4x256xf32> to vector<4x256xf32>
    %23 = arith.mulf %22, %20 : vector<4x256xf32>
    %c0_18 = arith.constant 0 : index
    %c0_19 = arith.constant 0 : index
    %c0_20 = arith.constant 0 : index
    %24 = vector.load %arg8[%c0_18, %c0_19, %c0_20] : memref<1x4x256xf32, #tpu.memory_space<vmem>>, vector<1x4x256xf32>
    %25 = vector.shape_cast %24 : vector<1x4x256xf32> to vector<4x256xf32>
    %26 = vector.shape_cast %23 : vector<4x256xf32> to vector<1x4x256xf32>
    tpu.vector_store %arg8[%c0_18, %c0_19, %c0_20], %26 {strides = array<i32>} : memref<1x4x256xf32, #tpu.memory_space<vmem>>, vector<1x4x256xf32>,
    return
  }
  func.func @transform_0(%arg0: i32, %arg1: i32) -> (i32, i32, i32) {
    %c0_i32 = arith.constant 0 : i32
    %c0_i32_0 = arith.constant 0 : i32
    return %arg0, %c0_i32, %arg1 : i32, i32, i32
  }
  func.func @transform_1(%arg0: i32, %arg1: i32) -> (i32, i32, i32) {
    %c0_i32 = arith.constant 0 : i32
    %c0_i32_0 = arith.constant 0 : i32
    return %arg0, %c0_i32, %arg1 : i32, i32, i32
  }
  func.func @transform_2(%arg0: i32, %arg1: i32) -> (i32, i32) {
    %c0_i32 = arith.constant 0 : i32
    %c0_i32_0 = arith.constant 0 : i32
    %c0_i32_1 = arith.constant 0 : i32
    return %c0_i32, %c0_i32_0 : i32, i32
  }
  func.func @transform_3(%arg0: i32, %arg1: i32) -> (i32, i32) {
    %c0_i32 = arith.constant 0 : i32
    %c0_i32_0 = arith.constant 0 : i32
    %c0_i32_1 = arith.constant 0 : i32
    return %c0_i32, %c0_i32_0 : i32, i32
  }
  func.func @transform_4(%arg0: i32, %arg1: i32) -> (i32, i32) {
    %c0_i32 = arith.constant 0 : i32
    %c0_i32_0 = arith.constant 0 : i32
    %c0_i32_1 = arith.constant 0 : i32
    return %c0_i32, %c0_i32_0 : i32, i32
  }
  func.func @transform_5(%arg0: i32, %arg1: i32) -> (i32, i32) {
    %c0_i32 = arith.constant 0 : i32
    %c0_i32_0 = arith.constant 0 : i32
    %c0_i32_1 = arith.constant 0 : i32
    return %c0_i32, %c0_i32_0 : i32, i32
  }
  func.func @transform_6(%arg0: i32, %arg1: i32) -> (i32, i32, i32) {
    %c0_i32 = arith.constant 0 : i32
    %c0_i32_0 = arith.constant 0 : i32
    return %arg0, %c0_i32, %arg1 : i32, i32, i32
  }
}

</mosaic_0001>

<bundles_post_ra>
// kernel: se_layer.1
= control target key start
LH: loop header
LB: loop body
LE: loop exit
PB: predicated region body
PF: predicated region fallthrough
CT: control target
= control target key end

     0   :  { %s681_s21 = smov 0   ;;  %s683_s22 = smov 0   ;;  %s743_s0 = inlined_call_operand.vmem [shape: f32[2,4,256], index: 0, kind: input, shape index: {}]   ;;  %s744_s1 = inlined_call_operand.vmem [shape: f32[2,4,256], index: 1, kind: input, shape index: {}]   ;;  %s745_s2 = inlined_call_operand.vmem [shape: f32[4,4], index: 2, kind: input, shape index: {}]   ;;  %s746_s3 = inlined_call_operand.vmem [shape: f32[4,1], index: 3, kind: input, shape index: {}]   ;;  %s747_s4 = inlined_call_operand.vmem [shape: f32[4,4], index: 4, kind: input, shape index: {}]   ;;  %s748_s5 = inlined_call_operand.vmem [shape: f32[4,1], index: 5, kind: input, shape index: {}]   ;;  %s749_s6 = inlined_call_operand.vmem [shape: f32[2,4,256], index: 6, kind: output, shape index: {}]  }
   0x1   :  { %s685_s23 = smov 0  }
   0x2 LB: > { %s28_s24 = sadd.s32 1, %s639_s22  ;;  %p571_p0 = scmp.ge.s32.totalorder %s643_s23, 1  ;;  %s643_s23 = sphi %s685_s23, %s16_s23   ;;  %s639_s22 = sphi %s683_s22, %s751_s22   ;;  %s635_s21 = sphi %s681_s21, %s750_s21  }
   0x3   : > { %p30_p1 = scmp.ge.s32.totalorder %s28_s24, 2  ;;  %p250_p2 = scmp.lt.s32.totalorder %s643_s23, 3 }
   0x5   : > { %s753_s24 = smov (%p30_p1, %s28_s24), 0  ;;  %p251_p3 = pnand %p571_p0, %p250_p2 }
   0x6   : > { %p298_p4 = scmp.lt.s32.totalorder (!%p251_p3), %s635_s21, 1 }
   0x7   : > { %254 = sbr.rel (%p251_p3) target bundleno = 310 (0x136), region = 44 }
   0xc   : > { %v645_v0 = vmov 0   ;;  %v329_v1 = vld [vmem:[%s746_s3] sm:$0xf]  ;;  %s755_s21 = smov (!%p298_p4, %s635_s21), 1  ;;  %vm343_vm0 = vcmask 1043456   ;;  %vm339_vm1 = vcmask 31744  }
   0xd   : > { %616 = vset.pattern.permute.xlu0 %v645_v0  ;;  %s702_s27 = sshll.u32 %s755_s21, 3  ;;  %v391_v3 = vld [vmem:[%s748_s5] sm:$0xf] }
   0xe   : > { %332 = vperm.xlu0 %616, %v329_v1   ;;  %s315_s30 = scalar_lea.vmem %s744_s1, %s702_s27  ;;  %v328_v4 = vld [vmem:[%s745_s2] sm:$0xf]  ;;  %s305_s15 = scalar_lea.vmem %s743_s0, %s702_s27 }
   0xf   : > { %v327_v2 = vld [vmem:[%s315_s30] sm:$0xff]  ;;  %s325_s18 = scalar_lea.vmem %s749_s6, %s702_s27 }
  0x10   : > { %336 = vst [vmem:[#allocation1] ss:$2 sm:$0xff] %v327_v2  ;;  %v390_v14 = vld [vmem:[%s747_s4] sm:$0xf] }
  0x11   : > { %v454_v28 = vld [vmem:[%s305_s15] sm:$0xff] }
  0x16   : > { %394 = vperm.xlu0 %616, %v391_v3  }
  0x17   : > { %v337_v5 = vld.sshfl [vmem:[#allocation1] sm:$0xff pattern:$0x75316420]  ;;  %v338_v6 = vld.sshfl [vmem:[#allocation1 + $0x8] sm:$0xff pattern:$0x75316420] }
  0x18   : > { %578 = vmatpush.msk.msra.mxu0 %vm343_vm0, %v337_v5  ;;  %580 = vmatpush.msk.msra.mxu1 %vm343_vm0, %v338_v6 }
  0x19   : > { %579 = vmatmul.msk.f32.vlgmr.msra.gmra.mxu0 %vm339_vm1, %v328_v4  ;;  %581 = vmatmul.msk.f32.vlgmr.msra.gmra.mxu1 %vm339_vm1, %v328_v4 }
  0x80   : > { %v333_v7 = vpop.permute.xlu0 %332 }
  0x88   : > { %v395_v15 = vpop.permute.xlu0 %394 }
  0x96   : > { %v365_v8 = vpop.f32.mrf.mxu0  ;;  %v385_v9 = vpop.f32.mrf.mxu1 }
  0x97   : > { %v366_v10 = vadd.f32 %v365_v8, %v333_v7  ;;  %v386_v11 = vadd.f32 %v385_v9, %v333_v7 }
  0x99   : > { %v388_v12 = vmax.f32 %v366_v10, 0.0  ;;  %v389_v13 = vmax.f32 %v386_v11, 0.0 }
  0x9b   : > { %582 = vmatpush.msk.msra.mxu2 %vm343_vm0, %v388_v12  ;;  %584 = vmatpush.msk.msra.mxu3 %vm343_vm0, %v389_v13 }
  0x9c   : > { %583 = vmatmul.msk.f32.vlgmr.msra.gmra.mxu2 %vm339_vm1, %v390_v14  ;;  %585 = vmatmul.msk.f32.vlgmr.msra.gmra.mxu3 %vm339_vm1, %v390_v14 }
 0x11f   : > { %v423_v16 = vpop.f32.mrf.mxu2  ;;  %v443_v17 = vpop.f32.mrf.mxu3 }
 0x120   : > { %v424_v18 = vadd.f32 %v423_v16, %v395_v15  ;;  %v444_v19 = vadd.f32 %v443_v17, %v395_v15 }
 0x122   : > { %v446_v20 = vmul.f32 0.5, %v424_v18  ;;  %v447_v21 = vmul.f32 0.5, %v444_v19 }
 0x124   : > { %617 = vtanh.f32 %v446_v20 }
 0x125   : > { %619 = vtanh.f32 %v447_v21 }
 0x12a   : > { %v618_v22 = vpop.eup %617 }
 0x12b   : > { %v620_v23 = vpop.eup %619  ;;  %v450_v24 = vadd.f32 1.0, %v618_v22 }
 0x12c   : > { %v451_v25 = vadd.f32 1.0, %v620_v23 }
 0x12d   : > { %v452_v27 = vmul.f32 0.5, %v450_v24 }
 0x12e   : > { %v453_v26 = vmul.f32 0.5, %v451_v25 }
 0x130   : > { %v457_v29 = vrot.slane %v453_v26, 4 }
 0x132   : > { %v458_v30 = vsel %vm343_vm0, %v452_v27, %v457_v29 }
 0x133   : > { %v460_v31 = vmul.f32 %v458_v30, %v454_v28 }
 0x135   : > { %461 = vst [vmem:[%s325_s18] sm:$0xff] %v460_v31 }
 0x136 PF: > { %s16_s23 = sadd.s32 1, %s643_s23   ;;  %s750_s21 = smov %s639_s22 }
 0x137   : > { %p13_p5 = scmp.ge.s32.totalorder %s16_s23, 4   ;;  %s751_s22 = smov %s753_s24 }
 0x139   :  { %15 = sbr.rel (!%p13_p5) target bundleno = 2 (0x2), region = 77 }

</bundles_post_ra>
